<compile_context>
chip_gen: v5e
topology: v5e:2x2
jax: 0.10.0
libtpu: 0.0.40
codegen_flags: <defaults>
</compile_context>

<pallas_src>
import jax
import jax.numpy as jnp
from jax.experimental import pallas as pl
from jax.experimental.pallas import tpu as pltpu


def _apply_style_kernel(lat_ref, wg_ref, wb_ref, bg_ref, bb_ref, x_ref, o_ref):
    # Style projection (tiny; weights are VMEM-resident, recompute per tile is free
    # relative to the memory-bound modulation).
    lat = lat_ref[0]                                                       # (1, L)
    gamma = jnp.dot(lat, wg_ref[...],
                    preferred_element_type=jnp.float32) + bg_ref[...]      # (1, C)
    beta = jnp.dot(lat, wb_ref[...],
                   preferred_element_type=jnp.float32) + bb_ref[...]       # (1, C)

    x = x_ref[...].astype(jnp.float32)                                     # (1, C, THW)
    y = gamma[:, :, None] * x + beta[:, :, None]
    o_ref[...] = y.astype(o_ref.dtype)


def apply_style(x, latent, weight, bias, *, thw_target=2048):
    """Pallas ApplyStyle forward.

    x      : (B, C, H, W)
    latent : (B, L)
    weight : (2*C, L)   -- PyTorch nn.Linear weight layout
    bias   : (2*C,)
    """
    B, C, H, W = x.shape
    _, L = latent.shape
    assert weight.shape == (2 * C, L)
    assert bias.shape == (2 * C,)

    HW = H * W
    # Lane-dense spatial tile: cap the tile size for big maps (multiple of 128),
    # otherwise take the full extent (full-dim blocks are always legal).
    if HW % 128 == 0 and HW > thw_target:
        thw = thw_target
    else:
        thw = HW
    grid = (B, pl.cdiv(HW, thw))

    # Split the Linear into gamma / beta halves (matches style.chunk(2, dim=1)).
    wg = jnp.transpose(weight[:C, :]).astype(jnp.float32)     # (L, C)
    wb = jnp.transpose(weight[C:, :]).astype(jnp.float32)     # (L, C)
    bg = bias[:C].reshape(1, C).astype(jnp.float32)           # (1, C)
    bb = bias[C:].reshape(1, C).astype(jnp.float32)           # (1, C)

    x_flat = x.reshape(B, C, HW)                               # free view of NCHW
    lat3 = latent.reshape(B, 1, L).astype(jnp.float32)         # (B, 1, L)

    out = pl.pallas_call(
        _apply_style_kernel,
        out_shape=jax.ShapeDtypeStruct((B, C, HW), x.dtype),
        grid=grid,
        in_specs=[
            pl.BlockSpec((1, 1, L), lambda b, t: (b, 0, 0)),     # latent row for batch b
            pl.BlockSpec((L, C), lambda b, t: (0, 0)),           # W_gamma (resident)
            pl.BlockSpec((L, C), lambda b, t: (0, 0)),           # W_beta  (resident)
            pl.BlockSpec((1, C), lambda b, t: (0, 0)),           # b_gamma
            pl.BlockSpec((1, C), lambda b, t: (0, 0)),           # b_beta
            pl.BlockSpec((1, C, thw), lambda b, t: (b, 0, t)),   # x tile
        ],
        out_specs=pl.BlockSpec((1, C, thw), lambda b, t: (b, 0, t)),
        compiler_params=pltpu.CompilerParams(
            dimension_semantics=("parallel", "parallel")),
    )(lat3, wg, wb, bg, bb, x_flat)

    return out.reshape(B, C, H, W)


if __name__ == "__main__":
    key = jax.random.PRNGKey(0)
    kx, kl, kw, kb = jax.random.split(key, 4)

    B, C, H, W = 2, 64, 16, 16   # batch=2, channels=64, spatial=16x16
    L = 32                       # latent_size

    x = jax.random.normal(kx, (B, C, H, W), dtype=jnp.float32)
    latent = jax.random.normal(kl, (B, L), dtype=jnp.float32)
    weight = 0.05 * jax.random.normal(kw, (2 * C, L), dtype=jnp.float32)
    bias = 0.05 * jax.random.normal(kb, (2 * C,), dtype=jnp.float32)

    out = apply_style(x, latent, weight, bias)
    jax.block_until_ready(out)

    # Pure-JAX reference (mirrors the PyTorch module exactly).
    style = jnp.dot(latent, weight.T,
                    precision=jax.lax.Precision.HIGHEST) + bias     # (B, 2C)
    gamma_ref = style[:, :C][:, :, None, None]
    beta_ref = style[:, C:][:, :, None, None]
    ref = gamma_ref * x + beta_ref

    assert out.shape == (B, C, H, W)
    err = float(jnp.max(jnp.abs(out - ref)))
    assert jnp.allclose(out, ref, atol=1e-4, rtol=1e-4), err
    print("KERNEL_OK")
</pallas_src>

<mosaic_0001>
module attributes {stable_mosaic.version = 11 : i64} {
  func.func @_apply_style_kernel(%arg0: i32, %arg1: i32, %arg2: memref<1x1x32xf32, #tpu.memory_space<vmem>>, %arg3: memref<32x64xf32, #tpu.memory_space<vmem>>, %arg4: memref<32x64xf32, #tpu.memory_space<vmem>>, %arg5: memref<1x64xf32, #tpu.memory_space<vmem>>, %arg6: memref<1x64xf32, #tpu.memory_space<vmem>>, %arg7: memref<1x64x256xf32, #tpu.memory_space<vmem>>, %arg8: memref<1x64x256xf32, #tpu.memory_space<vmem>>) attributes {dimension_semantics = [#tpu.dimension_semantics<parallel>, #tpu.dimension_semantics<parallel>], iteration_bounds = array<i64: 2, 1>, scalar_prefetch = 0 : i64, scratch_operands = 0 : i64, tpu.core_type = #tpu.core_type<tc>, window_params = [{transform_indices = @transform_0, window_bounds = array<i64: 1, 1, 32>}, {pipeline_mode = #tpu.pipeline_mode<synchronous>, transform_indices = @transform_1, window_bounds = array<i64: 32, 64>}, {pipeline_mode = #tpu.pipeline_mode<synchronous>, transform_indices = @transform_2, window_bounds = array<i64: 32, 64>}, {pipeline_mode = #tpu.pipeline_mode<synchronous>, transform_indices = @transform_3, window_bounds = array<i64: 1, 64>}, {pipeline_mode = #tpu.pipeline_mode<synchronous>, transform_indices = @transform_4, window_bounds = array<i64: 1, 64>}, {transform_indices = @transform_5, window_bounds = array<i64: 1, 64, 256>}, {transform_indices = @transform_6, window_bounds = array<i64: 1, 64, 256>}]} {
    %c0 = arith.constant 0 : index
    %c0_0 = arith.constant 0 : index
    %c0_1 = arith.constant 0 : index
    %0 = vector.load %arg2[%c0, %c0_0, %c0_1] : memref<1x1x32xf32, #tpu.memory_space<vmem>>, vector<1x1x32xf32>
    %1 = vector.shape_cast %0 : vector<1x1x32xf32> to vector<1x32xf32>
    %c0_2 = arith.constant 0 : index
    %c0_3 = arith.constant 0 : index
    %2 = vector.load %arg3[%c0_2, %c0_3] : memref<32x64xf32, #tpu.memory_space<vmem>>, vector<32x64xf32>
    %cst = arith.constant dense<0.000000e+00> : vector<1x64xf32>
    %3 = tpu.matmul %1, %2, %cst {dimension_numbers = #tpu.dot_dimension_numbers<[1], [0], [0], [1], [0, 0, 1, 1], [], []>} : vector<1x32xf32>, vector<32x64xf32>, vector<1x64xf32> -> vector<1x64xf32>
    %c0_4 = arith.constant 0 : index
    %c0_5 = arith.constant 0 : index
    %4 = vector.load %arg5[%c0_4, %c0_5] : memref<1x64xf32, #tpu.memory_space<vmem>>, vector<1x64xf32>
    %5 = arith.addf %3, %4 : vector<1x64xf32>
    %c0_6 = arith.constant 0 : index
    %c0_7 = arith.constant 0 : index
    %6 = vector.load %arg4[%c0_6, %c0_7] : memref<32x64xf32, #tpu.memory_space<vmem>>, vector<32x64xf32>
    %cst_8 = arith.constant dense<0.000000e+00> : vector<1x64xf32>
    %7 = tpu.matmul %1, %6, %cst_8 {dimension_numbers = #tpu.dot_dimension_numbers<[1], [0], [0], [1], [0, 0, 1, 1], [], []>} : vector<1x32xf32>, vector<32x64xf32>, vector<1x64xf32> -> vector<1x64xf32>
    %c0_9 = arith.constant 0 : index
    %c0_10 = arith.constant 0 : index
    %8 = vector.load %arg6[%c0_9, %c0_10] : memref<1x64xf32, #tpu.memory_space<vmem>>, vector<1x64xf32>
    %9 = arith.addf %7, %8 : vector<1x64xf32>
    %c0_11 = arith.constant 0 : index
    %c0_12 = arith.constant 0 : index
    %c0_13 = arith.constant 0 : index
    %10 = vector.load %arg7[%c0_11, %c0_12, %c0_13] : memref<1x64x256xf32, #tpu.memory_space<vmem>>, vector<1x64x256xf32>
    %11 = vector.shape_cast %5 : vector<1x64xf32> to vector<1x64x1xf32>
    %12 = vector.broadcast %11 : vector<1x64x1xf32> to vector<1x64x256xf32>
    %13 = arith.mulf %12, %10 : vector<1x64x256xf32>
    %14 = vector.shape_cast %9 : vector<1x64xf32> to vector<1x64x1xf32>
    %15 = vector.broadcast %14 : vector<1x64x1xf32> to vector<1x64x256xf32>
    %16 = arith.addf %13, %15 : vector<1x64x256xf32>
    %c0_14 = arith.constant 0 : index
    %c0_15 = arith.constant 0 : index
    %c0_16 = arith.constant 0 : index
    %17 = vector.load %arg8[%c0_14, %c0_15, %c0_16] : memref<1x64x256xf32, #tpu.memory_space<vmem>>, vector<1x64x256xf32>
    tpu.vector_store %arg8[%c0_14, %c0_15, %c0_16], %16 {strides = array<i32>} : memref<1x64x256xf32, #tpu.memory_space<vmem>>, vector<1x64x256xf32>,
    return
  }
  func.func @transform_0(%arg0: i32, %arg1: i32) -> (i32, i32, i32) {
    %c0_i32 = arith.constant 0 : i32
    %c0_i32_0 = arith.constant 0 : i32
    %c0_i32_1 = arith.constant 0 : i32
    return %arg0, %c0_i32, %c0_i32_0 : i32, i32, i32
  }
  func.func @transform_1(%arg0: i32, %arg1: i32) -> (i32, i32) {
    %c0_i32 = arith.constant 0 : i32
    %c0_i32_0 = arith.constant 0 : i32
    %c0_i32_1 = arith.constant 0 : i32
    return %c0_i32, %c0_i32_0 : i32, i32
  }
  func.func @transform_2(%arg0: i32, %arg1: i32) -> (i32, i32) {
    %c0_i32 = arith.constant 0 : i32
    %c0_i32_0 = arith.constant 0 : i32
    %c0_i32_1 = arith.constant 0 : i32
    return %c0_i32, %c0_i32_0 : i32, i32
  }
  func.func @transform_3(%arg0: i32, %arg1: i32) -> (i32, i32) {
    %c0_i32 = arith.constant 0 : i32
    %c0_i32_0 = arith.constant 0 : i32
    %c0_i32_1 = arith.constant 0 : i32
    return %c0_i32, %c0_i32_0 : i32, i32
  }
  func.func @transform_4(%arg0: i32, %arg1: i32) -> (i32, i32) {
    %c0_i32 = arith.constant 0 : i32
    %c0_i32_0 = arith.constant 0 : i32
    %c0_i32_1 = arith.constant 0 : i32
    return %c0_i32, %c0_i32_0 : i32, i32
  }
  func.func @transform_5(%arg0: i32, %arg1: i32) -> (i32, i32, i32) {
    %c0_i32 = arith.constant 0 : i32
    %c0_i32_0 = arith.constant 0 : i32
    return %arg0, %c0_i32, %arg1 : i32, i32, i32
  }
  func.func @transform_6(%arg0: i32, %arg1: i32) -> (i32, i32, i32) {
    %c0_i32 = arith.constant 0 : i32
    %c0_i32_0 = arith.constant 0 : i32
    return %arg0, %c0_i32, %arg1 : i32, i32, i32
  }
}

</mosaic_0001>

<bundles_post_ra>
// kernel: tpu_custom_call.1
= control target key start
LH: loop header
LB: loop body
LE: loop exit
PB: predicated region body
PF: predicated region fallthrough
CT: control target
= control target key end

     0   :  { %s1324_s0 = inlined_call_operand.hbm [shape: f32[2,1,32], index: 0, kind: input, shape index: {}]   ;;  %s1325_s1 = inlined_call_operand.hbm [shape: f32[32,64], index: 1, kind: input, shape index: {}]   ;;  %s1326_s2 = inlined_call_operand.hbm [shape: f32[32,64], index: 2, kind: input, shape index: {}]   ;;  %s1327_s3 = inlined_call_operand.vmem [shape: f32[1,64], index: 3, kind: input, shape index: {}]   ;;  %s1328_s4 = inlined_call_operand.vmem [shape: f32[1,64], index: 4, kind: input, shape index: {}]   ;;  %s1329_s5 = inlined_call_operand.hbm [shape: f32[2,64,256], index: 5, kind: input, shape index: {}]   ;;  %s1330_s6 = inlined_call_operand.hbm [shape: f32[2,64,256], index: 6, kind: output, shape index: {}]  }
   0x1   :  { %1332 = sst [smem:[#allocation17_spill]] %s1324_s0 }
   0x2   :  { %1333 = sst [smem:[#allocation18_spill]] %s1325_s1 }
   0x3   :  { %1334 = sst [smem:[#allocation19_spill]] %s1326_s2 }
   0x4   :  { %11 = vsyncpa [#allocation3], 0 }
   0x5   :  { %13 = vsyncpa [#allocation3 + $0x1], 0 }
   0x6   :  { %14 = vsyncpa [#allocation6], 0 }
   0x7   :  { %15 = vsyncpa [#allocation9], 0 }
   0x8   :  { %17 = vsyncpa [#allocation9 + $0x1], 0 }
   0x9   :  { %18 = vsyncpa [#allocation4], 0 }
   0xa   :  { %20 = vsyncpa [#allocation4 + $0x1], 0  ;;  %s1109_s21 = smov 0   ;;  %s1111_s22 = smov 0  }
   0xb   :  { %s1113_s23 = smov 0   ;;  %s1115_s24 = smov 0  }
   0xc   :  { %s1117_s25 = smov 0   ;;  %s1119_s26 = smov 0  }
   0xd LB: > { %s720_s27 = sadd.s32 4294967295, %s1064_s26   ;;  %p722_p0 = scmp.ge.s32.totalorder %s1064_s26, 1  ;;  %s1064_s26 = sphi %s1119_s26, %s26_s26   ;;  %s1060_s25 = sphi %s1117_s25, %s1353_s25   ;;  %s1056_s24 = sphi %s1115_s24, %s1352_s24   ;;  %s1052_s23 = sphi %s1113_s23, %s1351_s23   ;;  %s1048_s22 = sphi %s1111_s22, %s1350_s22   ;;  %s1044_s21 = sphi %s1109_s21, %s1349_s21  }
   0xe   : > { %p1143_p1 = scmp.eq.s32.totalorder %s720_s27, 0  ;;  %p209_p2 = scmp.lt.s32.totalorder %s1064_s26, 3 }
   0xf   : > { %s1336_s1 = sld [smem:[#allocation18_spill]]  ;;  %s1066_s9 = smov [#allocation5]  }
  0x10   : > { %p1151_p3 = pnand %p722_p0, %p209_p2  ;;  %s222_s10 = sshll.u32 %s1066_s9, 4  ;;  %s223_s10 = int_to_ptr.vmem [resolvable:$true] %s222_s10 }
  0x11   : > { %p725_p6 = scmp.ge.s32.totalorder %s1064_s26, 2  ;;  %s1338_s2 = sld [smem:[#allocation19_spill]] }
  0x12   : > { %p757_p4 = pneg %p1151_p3  ;;  %s1067_s14 = smov 128  }
  0x13   : > { %s1068_s15 = smov 8   ;;  %s1069_s16 = smov [#allocation7]  }
  0x14   : > { %p758_p5 = pnand %p757_p4, %p1143_p1  ;;  %s236_s17 = sshll.u32 %s1069_s16, 4  ;;  %s237_s17 = int_to_ptr.vmem [resolvable:$true] %s236_s17 }
  0x15   : > { %s220_s7 = sshll.u32 %s1336_s1, 4  ;;  %s721_s18 = sadd.s32 4294967294, %s1064_s26   ;;  %s221_s7 = int_to_ptr.hbm [resolvable:$true] %s220_s7 }
  0x16   : > { %760 = dma.hbm_to_vmem [thread:$0]  (!%p758_p5), %s221_s7, 512, %s223_s10, [#allocation6], %s1067_s14, %s1067_s14, %s1068_s15  }
  0x17   : > { %s234_s13 = sshll.u32 %s1338_s2, 4  ;;  %s38_s19 = sadd.s32 1, %s1060_s25  ;;  %s235_s13 = int_to_ptr.hbm [resolvable:$true] %s234_s13 }
  0x18   : > { %763 = dma.hbm_to_vmem [thread:$0]  (!%p758_p5), %s235_s13, 512, %s237_s17, [#allocation6], %s1067_s14, %s1067_s14, %s1068_s15  }
  0x19   : > { %p40_p7 = scmp.ge.s32.totalorder %s38_s19, 2  ;;  %s45_s20 = sadd.s32 1, %s1052_s23 }
  0x1a   : > { %p52_p8 = scmp.ne.s32.totalorder %s1052_s23, %s1048_s22  ;;  %p53_p9 = scmp.eq.s32.totalorder %s1064_s26, 0 }
  0x1b   : > { %s1355_s19 = smov (%p40_p7, %s38_s19), 0  ;;  %p58_p11 = scmp.ne.s32.totalorder %s1048_s22, %s1044_s21 }
  0x1c   : > { %1339 = sst [smem:[#allocation15_spill]] %s1355_s19  ;;  %p1171_p10 = por %p53_p9, %p52_p8 }
  0x1d   : > { %s42_s30 = ssub.s32 %s1060_s25, %s1355_s19  ;;  %p196_p12 = scmp.eq.s32.totalorder %s720_s27, 1 }
  0x1e   : > { %p43_p13 = scmp.eq.s32.totalorder %s42_s30, 0  ;;  %p1183_p0 = por %p1143_p1, %p58_p11 }
  0x1f   : > { %p1187_p2 = por %p196_p12, %p52_p8  ;;  %p202_p4 = scmp.eq.s32.totalorder %s721_s18, 1 }
  0x20   : > { %s1192_s10 = scalar_select %p43_p13, %s1052_s23, %s45_s20  }
  0x21   : > { %p1194_p5 = por %p202_p4, %p58_p11  ;;  %p777_p7 = scmp.lt.s32.totalorder %s1064_s26, 2 }
  0x22   : > { %1343 = sst [smem:[#allocation16_spill]] %s1192_s10  ;;  %s256_s27 = sand.u32 1, %s1052_s23  }
  0x23   : > { %s1345_s0 = sld [smem:[#allocation17_spill]]  ;;  %s259_s16 = scalar_lea.vmem [#allocation2], %s256_s27 }
  0x24   : > { %s266_s17 = sshll.u32 %s259_s16, 4  ;;  %p1206_p8 = pnand %p777_p7, %p1171_p10  ;;  %s267_s17 = int_to_ptr.vmem [resolvable:$true] %s266_s17 }
  0x25   : > { %s726_s20 = sshll.u32 %s256_s27, 7  ;;  %s741_s30 = sshll.u32 %s1060_s25, 7 }
  0x26   : > { %s257_s1 = scalar_lea.sflag [#allocation3], %s256_s27  ;;  %s284_s13 = scalar_lea.hbm %s1329_s5, %s741_s30 }
  0x27   : > { %s274_s29 = scalar_lea.sflag [#allocation9], %s256_s27  ;;  %s1070_s19 = smov 256  }
  0x28   : > { %s1071_s10 = smov 16  }
  0x29   : > { %s262_s14 = scalar_lea.hbm %s1345_s0, %s1060_s25  ;;  %s285_s0 = sshll.u32 %s284_s13, 4  ;;  %s286_s0 = int_to_ptr.hbm [resolvable:$true] %s285_s0 }
  0x2a   : > { %s264_s15 = sshll.u32 %s262_s14, 4  ;;  %s277_s14 = scalar_lea.vmem [#allocation8], %s726_s20  ;;  %s265_s15 = int_to_ptr.hbm [resolvable:$true] %s264_s15 }
  0x2b   : > { %767 = dma.hbm_to_vmem [thread:$0]  (!%p1206_p8), %s265_s15, 16, %s267_s17, %s257_s1  }
  0x2c   : > { %s287_s16 = sshll.u32 %s277_s14, 4  ;;  %299 = sbr.rel (%p1151_p3) target bundleno = 395 (0x18b), region = 44  ;;  %s288_s16 = int_to_ptr.vmem [resolvable:$true] %s287_s16 }
  0x2d   : > { %770 = dma.hbm_to_vmem [thread:$0]  (!%p1206_p8), %s286_s0, 2048, %s288_s16, %s274_s29, %s1070_s19, %s1070_s19, %s1071_s10  }
  0x2e   : > { %s1221_s1 = sand.u32 (!%p1151_p3), 1, %s1048_s22  }
  0x2f   : > { %s302_s2 = scalar_lea.sflag (!%p1151_p3), [#allocation3], %s1221_s1  ;;  %s304_s15 = scalar_lea.vmem (!%p1151_p3), [#allocation2], %s1221_s1 }
  0x31   : > { %1027 = dma.done.wait (%p1183_p0), %s302_s2, 16  }
  0x32   : > { %1029 = vsyncadd (%p1183_p0), %s302_s2, 4294967280 }
  0x33   : > { %1031 = dma.done.wait (%p1143_p1), [#allocation6], 1024  }
  0x34   : > { %1033 = vsyncadd (%p1143_p1), [#allocation6], 4294966272  ;;  %s732_s0 = sshll.u32 %s1221_s1, 7  ;;  %s321_s8 = scalar_lea.sflag [#allocation9], %s1221_s1 }
  0x35   : > { %s1237_s19 = scalar_lea.vmem [#allocation8], %s732_s0 }
  0x36   : > { %1035 = dma.done.wait (%p1183_p0), %s321_s8, 2048  }
  0x37   : > { %1037 = vsyncadd (%p1183_p0), %s321_s8, 4294965248  ;;  %v432_v0 = vlaneseq  ;;  %v364_v4 = vld [vmem:[#allocation5 + $0x18] sm:$0xff]  ;;  %v363_v5 = vld [vmem:[#allocation5 + $0x10] sm:$0xff]  ;;  %vm366_vm0 = vcmask 261120   ;;  %s1253_s17 = scalar_lea.vmem [#allocation10], %s732_s0  ;;  %s742_s18 = sshll.u32 %s1056_s24, 7 }
  0x38   : > { %382 = vmatpush.msra.mxu0 %v364_v4  ;;  %v393_v6 = vld [vmem:[#allocation7 + $0x18] sm:$0xff]  ;;  %v362_v7 = vld [vmem:[#allocation5 + $0x8] sm:$0xff]  ;;  %v392_v8 = vld [vmem:[#allocation7 + $0x10] sm:$0xff]  ;;  %s591_s12 = scalar_lea.hbm %s1330_s6, %s742_s18  ;;  %s592_s13 = sshll.u32 %s1253_s17, 4  ;;  %s593_s13 = int_to_ptr.vmem [resolvable:$true] %s592_s13 }
  0x39   : > { %v433_v1 = vshrl.u32 %v432_v0, 7  ;;  %407 = vmatpush.msra.mxu1 %v393_v6  ;;  %v391_v9 = vld [vmem:[#allocation7 + $0x8] sm:$0xff]  ;;  %v361_v10 = vld [vmem:[#allocation5] sm:$0xff]  ;;  %v360_v11 = vld [vmem:[%s304_s15] sm:$0x1]  ;;  %s594_s14 = sshll.u32 %s591_s12, 4  ;;  %s595_s14 = int_to_ptr.hbm [resolvable:$true] %s594_s14 }
  0x3a   : > { %383 = vmatpush.msra.mxu0 %v363_v5  ;;  %v390_v12 = vld [vmem:[#allocation7] sm:$0xff]  ;;  %v365_v13 = vld [vmem:[%s1327_s3] sm:$0x1]  ;;  %v420_v31 = vld [vmem:[%s1237_s19 + $0x28] sm:$0xff]  ;;  %s578_s16 = scalar_lea.sflag [#allocation4], %s1221_s1  ;;  %s988_s24 = sshra.s32 %s595_s14, 4  ;;  %s989_s24 = int_to_ptr.hbm [resolvable:$true] %s988_s24 }
  0x3b   : > { %837 = vset.pattern.permute.xlu0 %v433_v1  ;;  %v458_v2 = vadd.s32 32, %v433_v1  ;;  %v446_v3 = vadd.s32 16, %v433_v1  ;;  %408 = vmatpush.msra.mxu1 %v392_v8  ;;  %v464_v17 = vadd.s32 40, %v433_v1  ;;  %v452_v18 = vadd.s32 24, %v433_v1  ;;  %v394_v22 = vld [vmem:[%s1328_s4] sm:$0x1]  ;;  %p995_p10 = scmp.lt.s32.totalorder %s989_s24, %s1330_s6 }
  0x3c   : > { %384 = vmatpush.msra.mxu0 %v362_v7  ;;  %v440_v19 = vadd.s32 8, %v433_v1  ;;  %v476_v20 = vadd.s32 56, %v433_v1  ;;  %v470_v21 = vadd.s32 48, %v433_v1  ;;  %v419_v30 = vld [vmem:[%s1237_s19 + $0x20] sm:$0xff]  ;;  %v416_v40 = vld [vmem:[%s1237_s19 + $0x8] sm:$0xff]  ;;  %v417_v55 = vld [vmem:[%s1237_s19 + $0x10] sm:$0xff] }
  0x3d   : > { %841 = vset.pattern.permute.xlu2 %v458_v2  ;;  %839 = vset.pattern.permute.xlu1 %v446_v3  ;;  %v415_v39 = vld [vmem:[%s1237_s19] sm:$0xff]  ;;  %v424_v48 = vld [vmem:[%s1237_s19 + $0x48] sm:$0xff]  ;;  %v418_v56 = vld [vmem:[%s1237_s19 + $0x18] sm:$0xff]  ;;  %s990_s29 = scalar_lea.hbm %s989_s24, 128  ;;  %s994_s0 = scalar_lea.hbm %s1330_s6, 256 }
  0x3e   : > { %409 = vmatpush.msra.mxu1 %v391_v9  ;;  %385 = vmatpush.msra.mxu0 %v361_v10  ;;  %v423_v47 = vld [vmem:[%s1237_s19 + $0x40] sm:$0xff]  ;;  %v425_v57 = vld [vmem:[%s1237_s19 + $0x50] sm:$0xff]  ;;  %v426_v58 = vld [vmem:[%s1237_s19 + $0x58] sm:$0xff]  ;;  %p991_p1 = scmp.ne.s32.totalorder %s989_s24, %s990_s29  ;;  %p996_p11 = scmp.lt.s32.totalorder %s994_s0, %s990_s29 }
  0x3f   : > { %734 = vmatmul.msk.f32.vlgmr.msra.gmra.mxu0 %vm366_vm0, %v360_v11  ;;  %v429_v5 = vld [vmem:[%s1237_s19 + $0x70] sm:$0xff]  ;;  %v430_v6 = vld [vmem:[%s1237_s19 + $0x78] sm:$0xff] }
  0x40   : > { %410 = vmatpush.msra.mxu1 %v390_v12  ;;  %v421_v12 = vld [vmem:[%s1237_s19 + $0x30] sm:$0xff]  ;;  %p992_p3 = pnand %p991_p1, %p1187_p2  ;;  %p997_p12 = por %p996_p11, %p995_p10 }
  0x41   : > { %735 = vmatmul.msk.f32.vlgmr.msra.gmra.mxu1 %vm366_vm0, %v360_v11 }
  0x42   : > { %p993_p9 = pneg %p992_p3 }
  0x44   : > { %p998_p13 = pnand %p997_p12, %p993_p9 }
  0xbc   : > { %v387_v14 = vpop.f32.mrf.mxu0 }
  0xbd   : > { %v388_v15 = vadd.f32 %v387_v14, %v365_v13  ;;  %v422_v13 = vld [vmem:[%s1237_s19 + $0x38] sm:$0xff] }
  0xbe   : > { %v412_v23 = vpop.f32.mrf.mxu1 }
  0xbf   : > { %v431_v16 = vperm.slane %v388_v15, 0  ;;  %v413_v24 = vadd.f32 %v412_v23, %v394_v22 }
  0xc1   : > { %460 = vperm.xlu2 %841, %v431_v16   ;;  %448 = vperm.xlu1 %839, %v431_v16   ;;  %v496_v25 = vperm.slane %v413_v24, 0 }
  0xc2   : > { %436 = vperm.xlu0 %837, %v431_v16  }
  0xc9   : > { %842 = vset.pattern.permute.xlu2 %v464_v17  ;;  %840 = vset.pattern.permute.xlu1 %v452_v18 }
  0xca   : > { %838 = vset.pattern.permute.xlu0 %v440_v19 }
  0xd1   : > { %466 = vperm.xlu2 %842, %v431_v16   ;;  %454 = vperm.xlu1 %840, %v431_v16  }
  0xd2   : > { %442 = vperm.xlu0 %838, %v431_v16  }
  0xd9   : > { %844 = vset.pattern.permute.xlu2 %v476_v20  ;;  %843 = vset.pattern.permute.xlu1 %v470_v21 }
  0xda   : > { %845 = vset.pattern.permute.xlu0 %v433_v1 }
  0xe1   : > { %478 = vperm.xlu2 %844, %v431_v16   ;;  %472 = vperm.xlu1 %843, %v431_v16  }
  0xe2   : > { %501 = vperm.xlu0 %845, %v496_v25  }
  0xe9   : > { %847 = vset.pattern.permute.xlu2 %v446_v3  ;;  %846 = vset.pattern.permute.xlu1 %v440_v19  ;;  %v427_v19 = vld [vmem:[%s1237_s19 + $0x60] sm:$0xff] }
  0xea   : > { %850 = vset.pattern.permute.xlu0 %v464_v17 }
  0xf1   : > { %513 = vperm.xlu2 %847, %v496_v25   ;;  %507 = vperm.xlu1 %846, %v496_v25  }
  0xf2   : > { %531 = vperm.xlu0 %850, %v496_v25  }
  0xf9   : > { %849 = vset.pattern.permute.xlu2 %v458_v2  ;;  %848 = vset.pattern.permute.xlu1 %v452_v18 }
  0xfa   : > { %853 = vset.pattern.permute.xlu0 %v476_v20 }
 0x101   : > { %525 = vperm.xlu2 %849, %v496_v25   ;;  %519 = vperm.xlu1 %848, %v496_v25  }
 0x109   : > { %852 = vset.pattern.permute.xlu2 %v476_v20  ;;  %851 = vset.pattern.permute.xlu1 %v470_v21  ;;  %v428_v20 = vld [vmem:[%s1237_s19 + $0x68] sm:$0xff] }
 0x111   : > { %543 = vperm.xlu2 %852, %v496_v25   ;;  %537 = vperm.xlu1 %851, %v496_v25  }
 0x11b   : > { %v461_v26 = vpop.permute.xlu2 %460 }
 0x11c   : > { %v488_v49 = vmul.f32 %v461_v26, %v423_v47  ;;  %v489_v50 = vmul.f32 %v461_v26, %v424_v48 }
 0x12b   : > { %v467_v27 = vpop.permute.xlu2 %466 }
 0x12c   : > { %v490_v61 = vmul.f32 %v467_v27, %v425_v57  ;;  %v491_v62 = vmul.f32 %v467_v27, %v426_v58 }
 0x133   : > { %v449_v32 = vpop.permute.xlu1 %448 }
 0x134   : > { %v437_v29 = vpop.permute.xlu0 %436  ;;  %v484_v33 = vmul.f32 %v449_v32, %v419_v30  ;;  %v485_v34 = vmul.f32 %v449_v32, %v420_v31 }
 0x135   : > { %v480_v41 = vmul.f32 %v437_v29, %v415_v39  ;;  %v481_v42 = vmul.f32 %v437_v29, %v416_v40 }
 0x13b   : > { %v479_v28 = vpop.permute.xlu2 %478 }
 0x13c   : > { %v494_v7 = vmul.f32 %v479_v28, %v429_v5  ;;  %v495_v8 = vmul.f32 %v479_v28, %v430_v6 }
 0x143   : > { %v455_v43 = vpop.permute.xlu1 %454 }
 0x144   : > { %v443_v36 = vpop.permute.xlu0 %442  ;;  %v486_v14 = vmul.f32 %v455_v43, %v421_v12  ;;  %v487_v15 = vmul.f32 %v455_v43, %v422_v13 }
 0x145   : > { %v482_v59 = vmul.f32 %v443_v36, %v417_v55  ;;  %v483_v60 = vmul.f32 %v443_v36, %v418_v56 }
 0x14b   : > { %v514_v35 = vpop.permute.xlu2 %513 }
 0x14c   : > { %v549_v37 = vadd.f32 %v514_v35, %v484_v33  ;;  %v550_v38 = vadd.f32 %v514_v35, %v485_v34 }
 0x14e   : > { %565 = vst [vmem:[%s1253_s17 + $0x20] sm:$0xff] %v549_v37 }
 0x14f   : > { %566 = vst [vmem:[%s1253_s17 + $0x28] sm:$0xff] %v550_v38 }
 0x153   : > { %v473_v51 = vpop.permute.xlu1 %472 }
 0x154   : > { %v502_v44 = vpop.permute.xlu0 %501  ;;  %v492_v21 = vmul.f32 %v473_v51, %v427_v19  ;;  %v493_v22 = vmul.f32 %v473_v51, %v428_v20 }
 0x155   : > { %v545_v45 = vadd.f32 %v502_v44, %v480_v41  ;;  %v546_v46 = vadd.f32 %v502_v44, %v481_v42 }
 0x157   : > { %561 = vst [vmem:[%s1253_s17] sm:$0xff] %v545_v45 }
 0x158   : > { %562 = vst [vmem:[%s1253_s17 + $0x8] sm:$0xff] %v546_v46 }
 0x15b   : > { %v526_v52 = vpop.permute.xlu2 %525 }
 0x15c   : > { %v553_v53 = vadd.f32 %v526_v52, %v488_v49  ;;  %v554_v54 = vadd.f32 %v526_v52, %v489_v50 }
 0x15e   : > { %569 = vst [vmem:[%s1253_s17 + $0x40] sm:$0xff] %v553_v53 }
 0x15f   : > { %570 = vst [vmem:[%s1253_s17 + $0x48] sm:$0xff] %v554_v54 }
 0x163   : > { %v508_v63 = vpop.permute.xlu1 %507 }
 0x164   : > { %v547_v0 = vadd.f32 %v508_v63, %v482_v59  ;;  %v548_v1 = vadd.f32 %v508_v63, %v483_v60  ;;  %v532_v2 = vpop.permute.xlu0 %531 }
 0x165   : > { %v555_v3 = vadd.f32 %v532_v2, %v490_v61  ;;  %v556_v4 = vadd.f32 %v532_v2, %v491_v62 }
 0x166   : > { %563 = vst [vmem:[%s1253_s17 + $0x10] sm:$0xff] %v547_v0 }
 0x167   : > { %564 = vst [vmem:[%s1253_s17 + $0x18] sm:$0xff] %v548_v1 }
 0x168   : > { %571 = vst [vmem:[%s1253_s17 + $0x50] sm:$0xff] %v555_v3 }
 0x169   : > { %572 = vst [vmem:[%s1253_s17 + $0x58] sm:$0xff] %v556_v4 }
 0x16b   : > { %v544_v9 = vpop.permute.xlu2 %543 }
 0x16c   : > { %v559_v10 = vadd.f32 %v544_v9, %v494_v7  ;;  %v560_v11 = vadd.f32 %v544_v9, %v495_v8 }
 0x16e   : > { %575 = vst [vmem:[%s1253_s17 + $0x70] sm:$0xff] %v559_v10 }
 0x16f   : > { %576 = vst [vmem:[%s1253_s17 + $0x78] sm:$0xff] %v560_v11 }
 0x173   : > { %v520_v16 = vpop.permute.xlu1 %519 }
 0x174   : > { %v551_v17 = vadd.f32 %v520_v16, %v486_v14  ;;  %v552_v18 = vadd.f32 %v520_v16, %v487_v15 }
 0x176   : > { %567 = vst [vmem:[%s1253_s17 + $0x30] sm:$0xff] %v551_v17 }
 0x177   : > { %568 = vst [vmem:[%s1253_s17 + $0x38] sm:$0xff] %v552_v18 }
 0x183   : > { %v538_v23 = vpop.permute.xlu1 %537 }
 0x184   : > { %v557_v24 = vadd.f32 %v538_v23, %v492_v21  ;;  %v558_v25 = vadd.f32 %v538_v23, %v493_v22 }
 0x186   : > { %573 = vst [vmem:[%s1253_s17 + $0x60] sm:$0xff] %v557_v24 }
 0x187   : > { %574 = vst [vmem:[%s1253_s17 + $0x68] sm:$0xff] %v558_v25 }
 0x188   : > { %1001 = shalt.err (!%p998_p13)
}
 0x189   : > { %s1072_s1 = smov 256   ;;  %s1073_s28 = smov 16  }
 0x18a   : > { %755 = dma.vmem_to_hbm [thread:$0]  (%p1187_p2), %s593_s13, 2048, %s595_s14, %s578_s16, %s1072_s1, %s1072_s1, %s1073_s28  }
 0x18b PF: > { %s609_s7 = sand.u32 1, %s1044_s21   ;;  %p772_p0 = pnand %p725_p6, %p1194_p5 }
 0x18c   : > { %s610_s10 = scalar_lea.sflag [#allocation4], %s609_s7 }
 0x18d   : > { %p773_p4 = pneg %p772_p0 }
 0x18f   : > { %1039 = dma.done.wait (%p773_p4), %s610_s10, 2048  }
 0x190   : > { %1041 = vsyncadd (%p773_p4), %s610_s10, 4294965248  ;;  %s26_s26 = sadd.s32 1, %s1064_s26   ;;  %s1347_s27 = sld [smem:[#allocation16_spill]] }
 0x191   : > { %p23_p7 = scmp.ge.s32.totalorder %s26_s26, 4   ;;  %s1348_s9 = sld [smem:[#allocation15_spill]] }
 0x192   : > { %s1349_s21 = smov %s1048_s22  ;;  %s1350_s22 = smov %s1052_s23 }
 0x193   : > { %s1352_s24 = smov %s1060_s25  ;;  %25 = sbr.rel (!%p23_p7) target bundleno = 13 (0xd), region = 110 }
 0x196   : > { %s1351_s23 = smov %s1347_s27 }
 0x197   : > { %s1353_s25 = smov %s1348_s9 }
 0x198   :  { %616 = vsyncpa [#allocation3], 1 }
 0x199   :  { %618 = vsyncpa [#allocation3 + $0x1], 1 }
 0x19a   :  { %619 = vsyncpa [#allocation6], 1 }
 0x19b   :  { %620 = vsyncpa [#allocation9], 1 }
 0x19c   :  { %622 = vsyncpa [#allocation9 + $0x1], 1 }
 0x19d   :  { %623 = vsyncpa [#allocation4], 1 }
 0x19e   :  { %625 = vsyncpa [#allocation4 + $0x1], 1 }

</bundles_post_ra>
